<compile_context>
chip_gen: v7x
topology: tpu7x:2x2x1
jax: 0.10.0
libtpu: 0.0.40
codegen_flags: <defaults>
</compile_context>

<pallas_src>
import jax
import jax.numpy as jnp
import numpy as np
from jax.experimental import pallas as pl
from jax.experimental.pallas import tpu as pltpu


def _moving_avg_matrix(seq_len: int, kernel_size: int) -> np.ndarray:
    """Linear operator A (L, L) such that trend = x @ A.T reproduces DLinear's
    series_decomp moving average (AvgPool1d with replicate front/end padding)."""
    p = (kernel_size - 1) // 2
    A = np.zeros((seq_len, seq_len), dtype=np.float32)
    for t in range(seq_len):
        for w in range(t - p, t + p + 1):
            j = min(max(w, 0), seq_len - 1)
            A[t, j] += 1.0 / kernel_size
    return A


def _round_up(n: int, m: int) -> int:
    return ((n + m - 1) // m) * m


def sss_gemm_kernel(x_ref, k_ref, c_ref, o_ref):
    # x_ref: (TB, CL)  batch tile of flattened (C*L) inputs (no padding)
    # k_ref: (CL, P)   folded weight (constant block, loaded once)
    # c_ref: (1,  P)   folded bias
    # o_ref: (TB, P)   f32 output tile
    # f32 inputs -> force exact f32 MXU emulation; bf16 inputs are exact on the MXU.
    prec = jax.lax.Precision.HIGHEST if x_ref.dtype == jnp.float32 else None
    acc = jnp.dot(x_ref[...], k_ref[...],
                  preferred_element_type=jnp.float32, precision=prec)
    o_ref[...] = (acc + c_ref[...]).astype(o_ref.dtype)


def fold_sss_params(Ws, bs, Wt, bt, Wh, bh, moving_avg, seq_len, num_channels,
                    weight_dtype=jnp.float32):
    """Fold DLinear decomposition + encoder + flatten + head into one affine map.

    Done ONCE per model (not per forward call). Returns K_flat (C*L, P) in
    `weight_dtype` and const (P,) in f32 such that forward(x) == x_flat @ K_flat + const.
    """
    L, C = seq_len, num_channels
    A = jnp.asarray(_moving_avg_matrix(L, moving_avg))       # trend = x @ A.T
    At = A.T
    I = jnp.eye(L, dtype=jnp.float32)
    M = (I - At) @ Ws.T + At @ Wt.T                           # (L, L): z_c = x_c @ M + b
    b = bs + bt                                               # (L,)
    P = Wh.shape[0]
    WhT = Wh.T.reshape(C, L, P)                               # row-major flatten over (C, L)
    K = jnp.einsum('lt,ctp->clp', M, WhT)                     # K[c] = M @ WhT[c]
    K_flat = K.reshape(C * L, P).astype(weight_dtype)
    const = (bh + b @ WhT.sum(axis=0)).astype(jnp.float32)    # (P,)
    return K_flat, const


def _pick_batch_tile(B: int, block_batch: int) -> int:
    if B <= 8:
        return B                                   # full-dim block (legal for any B)
    # Aim for >= 2 grid steps so both v7x TensorCores get work; keep multiple of 8.
    half = _round_up(-(-B // 2), 8)
    return max(8, min(block_batch, half))


def sss_forward(x, K_flat, const, *, block_batch=512):
    """x: (B, C, L) -> (B, P) f32, via one batch-tiled GEMM + bias.

    For the mem-bound-optimal path, pass x already in K_flat.dtype (e.g. bf16)
    so the `.astype` below is a no-op and no extra HBM pass is added."""
    B, C, L = x.shape
    CL, P = K_flat.shape
    assert CL == C * L
    assert block_batch % 8 == 0

    x_flat = x.reshape(B, CL).astype(K_flat.dtype)
    c2d = const.reshape(1, P).astype(jnp.float32)

    TB = _pick_batch_tile(B, block_batch)
    num_tiles = pl.cdiv(B, TB)

    itm_x = x_flat.dtype.itemsize
    itm_w = K_flat.dtype.itemsize
    cost = pl.CostEstimate(
        flops=2 * B * CL * P,
        transcendentals=0,
        bytes_accessed=B * CL * itm_x + CL * P * itm_w + B * P * 4 + P * 4)

    # VMEM working set: double-buffered x/out tiles + single weight copy + bias.
    vmem_est = 2 * TB * CL * itm_x + 2 * TB * P * 4 + CL * P * itm_w + P * 4
    cp_kwargs = dict(dimension_semantics=("parallel",))
    if vmem_est > 24 * 1024 * 1024:
        # TODO(synk): for very large C*L, add a K grid axis ('arbitrary') with a
        # f32 VMEM accumulator instead of a monolithic weight block.
        cp_kwargs["vmem_limit_bytes"] = min(int(vmem_est * 2), 60 * 1024 * 1024)
    compiler_params = pltpu.CompilerParams(**cp_kwargs)

    def build(single_buffer_consts: bool):
        if single_buffer_consts:
            k_spec = pl.BlockSpec((CL, P), lambda i: (0, 0), pipeline_mode=pl.Buffered(1))
            c_spec = pl.BlockSpec((1, P), lambda i: (0, 0), pipeline_mode=pl.Buffered(1))
        else:
            k_spec = pl.BlockSpec((CL, P), lambda i: (0, 0))
            c_spec = pl.BlockSpec((1, P), lambda i: (0, 0))
        return pl.pallas_call(
            sss_gemm_kernel,
            out_shape=jax.ShapeDtypeStruct((B, P), jnp.float32),
            grid=(num_tiles,),
            in_specs=[
                pl.BlockSpec((TB, CL), lambda i: (i, 0)),   # x: batch-tiled, full CL
                k_spec,                                     # weight: loaded once
                c_spec,                                     # bias: loaded once
            ],
            out_specs=pl.BlockSpec((TB, P), lambda i: (i, 0)),
            compiler_params=compiler_params,
            cost_estimate=cost,
        )

    try:
        return build(True)(x_flat, K_flat, c2d)
    except Exception:
        # Fallback if pipeline_mode=pl.Buffered(1) is unsupported in this jax version.
        return build(False)(x_flat, K_flat, c2d)


if __name__ == "__main__":
    key = jax.random.PRNGKey(0)
    B, C, L, P = 2, 4, 16, 8          # batch, num_channels, seq_len, pred_len
    moving_avg = 5
    keys = jax.random.split(key, 8)

    x = jax.random.normal(keys[0], (B, C, L), dtype=jnp.float32)

    # DLinear backbone params (individual=False): two nn.Linear(seq_len, seq_len).
    lim = float(1.0 / np.sqrt(L))
    Ws = jax.random.uniform(keys[1], (L, L), jnp.float32, -lim, lim)   # (out, in)
    bs = jax.random.uniform(keys[2], (L,), jnp.float32, -lim, lim)
    Wt = jax.random.uniform(keys[3], (L, L), jnp.float32, -lim, lim)
    bt = jax.random.uniform(keys[4], (L,), jnp.float32, -lim, lim)

    # Head params: nn.Linear(C * L, pred_len).
    limh = float(1.0 / np.sqrt(C * L))
    Wh = jax.random.uniform(keys[5], (P, C * L), jnp.float32, -limh, limh)
    bh = jax.random.uniform(keys[6], (P,), jnp.float32, -limh, limh)

    # Pure-JAX reference following the original (unfused) module semantics.
    A = jnp.asarray(_moving_avg_matrix(L, moving_avg))
    trend_r = jnp.einsum('bcl,tl->bct', x, A)              # moving-average trend
    seasonal_r = x - trend_r
    z_r = (jnp.einsum('bcl,tl->bct', seasonal_r, Ws)
           + jnp.einsum('bcl,tl->bct', trend_r, Wt) + (bs + bt))
    ref = np.asarray(z_r.reshape(B, C * L) @ Wh.T + bh)

    # --- f32 path: exact module semantics, tight check -------------------------
    K32, c32 = fold_sss_params(Ws, bs, Wt, bt, Wh, bh, moving_avg, L, C,
                               weight_dtype=jnp.float32)
    out32 = jax.block_until_ready(sss_forward(x, K32, c32))
    assert out32.shape == (B, P)
    np.testing.assert_allclose(np.asarray(out32), ref, rtol=1e-4, atol=1e-5)

    # --- bf16 stream (f32 accumulate): the HBM-bandwidth-optimal path ----------
    K16, c16 = fold_sss_params(Ws, bs, Wt, bt, Wh, bh, moving_avg, L, C,
                               weight_dtype=jnp.bfloat16)
    out16 = jax.block_until_ready(sss_forward(x.astype(jnp.bfloat16), K16, c16))
    assert out16.shape == (B, P)
    np.testing.assert_allclose(np.asarray(out16), ref, rtol=3e-2, atol=3e-2)

    print("KERNEL_OK")
</pallas_src>

<mosaic_0001>
module attributes {stable_mosaic.version = 11 : i64} {
  func.func @sss_gemm_kernel(%arg0: i32, %arg1: memref<2x64xf32, #tpu.memory_space<vmem>>, %arg2: memref<64x8xf32, #tpu.memory_space<vmem>>, %arg3: memref<1x8xf32, #tpu.memory_space<vmem>>, %arg4: memref<2x8xf32, #tpu.memory_space<vmem>>) attributes {dimension_semantics = [#tpu.dimension_semantics<parallel>], iteration_bounds = array<i64: 1>, scalar_prefetch = 0 : i64, scratch_operands = 0 : i64, tpu.core_type = #tpu.core_type<tc>, window_params = [{transform_indices = @transform_0, window_bounds = array<i64: 2, 64>}, {pipeline_mode = #tpu.pipeline_mode<synchronous>, transform_indices = @transform_1, window_bounds = array<i64: 64, 8>}, {pipeline_mode = #tpu.pipeline_mode<synchronous>, transform_indices = @transform_2, window_bounds = array<i64: 1, 8>}, {transform_indices = @transform_3, window_bounds = array<i64: 2, 8>}]} {
    %c0 = arith.constant 0 : index
    %c0_0 = arith.constant 0 : index
    %0 = vector.load %arg1[%c0, %c0_0] : memref<2x64xf32, #tpu.memory_space<vmem>>, vector<2x64xf32>
    %c0_1 = arith.constant 0 : index
    %c0_2 = arith.constant 0 : index
    %1 = vector.load %arg2[%c0_1, %c0_2] : memref<64x8xf32, #tpu.memory_space<vmem>>, vector<64x8xf32>
    %cst = arith.constant dense<0.000000e+00> : vector<2x8xf32>
    %2 = tpu.matmul %0, %1, %cst {dimension_numbers = #tpu.dot_dimension_numbers<[1], [0], [0], [1], [0, 0, 1, 1], [], []>, precision = #tpu.contract_precision<fp32>} : vector<2x64xf32>, vector<64x8xf32>, vector<2x8xf32> -> vector<2x8xf32>
    %c0_3 = arith.constant 0 : index
    %c0_4 = arith.constant 0 : index
    %3 = vector.load %arg3[%c0_3, %c0_4] : memref<1x8xf32, #tpu.memory_space<vmem>>, vector<1x8xf32>
    %4 = vector.broadcast %3 : vector<1x8xf32> to vector<2x8xf32>
    %5 = arith.addf %2, %4 : vector<2x8xf32>
    %c0_5 = arith.constant 0 : index
    %c0_6 = arith.constant 0 : index
    %6 = vector.load %arg4[%c0_5, %c0_6] : memref<2x8xf32, #tpu.memory_space<vmem>>, vector<2x8xf32>
    tpu.vector_store %arg4[%c0_5, %c0_6], %5 {strides = array<i32>} : memref<2x8xf32, #tpu.memory_space<vmem>>, vector<2x8xf32>,
    return
  }
  func.func @transform_0(%arg0: i32) -> (i32, i32) {
    %c0_i32 = arith.constant 0 : i32
    %c0_i32_0 = arith.constant 0 : i32
    return %arg0, %c0_i32 : i32, i32
  }
  func.func @transform_1(%arg0: i32) -> (i32, i32) {
    %c0_i32 = arith.constant 0 : i32
    %c0_i32_0 = arith.constant 0 : i32
    %c0_i32_1 = arith.constant 0 : i32
    return %c0_i32, %c0_i32_0 : i32, i32
  }
  func.func @transform_2(%arg0: i32) -> (i32, i32) {
    %c0_i32 = arith.constant 0 : i32
    %c0_i32_0 = arith.constant 0 : i32
    %c0_i32_1 = arith.constant 0 : i32
    return %c0_i32, %c0_i32_0 : i32, i32
  }
  func.func @transform_3(%arg0: i32) -> (i32, i32) {
    %c0_i32 = arith.constant 0 : i32
    %c0_i32_0 = arith.constant 0 : i32
    return %arg0, %c0_i32 : i32, i32
  }
}

module attributes {stable_mosaic.version = 11 : i64} {
  func.func @sss_gemm_kernel(%arg0: i32, %arg1: memref<2x64xf32, #tpu.memory_space<vmem>>, %arg2: memref<64x8xf32, #tpu.memory_space<vmem>>, %arg3: memref<1x8xf32, #tpu.memory_space<vmem>>, %arg4: memref<2x8xf32, #tpu.memory_space<vmem>>) attributes {dimension_semantics = [#tpu.dimension_semantics<parallel>], iteration_bounds = array<i64: 1>, scalar_prefetch = 0 : i64, scratch_operands = 0 : i64, tpu.core_type = #tpu.core_type<tc>, window_params = [{transform_indices = @transform_0, window_bounds = array<i64: 2, 64>}, {pipeline_mode = #tpu.pipeline_mode<synchronous>, transform_indices = @transform_1, window_bounds = array<i64: 64, 8>}, {pipeline_mode = #tpu.pipeline_mode<synchronous>, transform_indices = @transform_2, window_bounds = array<i64: 1, 8>}, {transform_indices = @transform_3, window_bounds = array<i64: 2, 8>}]} {
    %c0 = arith.constant 0 : index
    %c0_0 = arith.constant 0 : index
    %0 = vector.load %arg1[%c0, %c0_0] : memref<2x64xf32, #tpu.memory_space<vmem>>, vector<2x64xf32>
    %c0_1 = arith.constant 0 : index
    %c0_2 = arith.constant 0 : index
    %1 = vector.load %arg2[%c0_1, %c0_2] : memref<64x8xf32, #tpu.memory_space<vmem>>, vector<64x8xf32>
    %cst = arith.constant dense<0.000000e+00> : vector<2x8xf32>
    %2 = tpu.matmul %0, %1, %cst {dimension_numbers = #tpu.dot_dimension_numbers<[1], [0], [0], [1], [0, 0, 1, 1], [], []>, precision = #tpu.contract_precision<fp32>} : vector<2x64xf32>, vector<64x8xf32>, vector<2x8xf32> -> vector<2x8xf32>
    %c0_3 = arith.constant 0 : index
    %c0_4 = arith.constant 0 : index
    %3 = vector.load %arg3[%c0_3, %c0_4] : memref<1x8xf32, #tpu.memory_space<vmem>>, vector<1x8xf32>
    %4 = vector.broadcast %3 : vector<1x8xf32> to vector<2x8xf32>
    %5 = arith.addf %2, %4 : vector<2x8xf32>
    %c0_5 = arith.constant 0 : index
    %c0_6 = arith.constant 0 : index
    %6 = vector.load %arg4[%c0_5, %c0_6] : memref<2x8xf32, #tpu.memory_space<vmem>>, vector<2x8xf32>
    tpu.vector_store %arg4[%c0_5, %c0_6], %5 {strides = array<i32>} : memref<2x8xf32, #tpu.memory_space<vmem>>, vector<2x8xf32>,
    return
  }
  func.func @transform_0(%arg0: i32) -> (i32, i32) {
    %c0_i32 = arith.constant 0 : i32
    %c0_i32_0 = arith.constant 0 : i32
    return %arg0, %c0_i32 : i32, i32
  }
  func.func @transform_1(%arg0: i32) -> (i32, i32) {
    %c0_i32 = arith.constant 0 : i32
    %c0_i32_0 = arith.constant 0 : i32
    %c0_i32_1 = arith.constant 0 : i32
    return %c0_i32, %c0_i32_0 : i32, i32
  }
  func.func @transform_2(%arg0: i32) -> (i32, i32) {
    %c0_i32 = arith.constant 0 : i32
    %c0_i32_0 = arith.constant 0 : i32
    %c0_i32_1 = arith.constant 0 : i32
    return %c0_i32, %c0_i32_0 : i32, i32
  }
  func.func @transform_3(%arg0: i32) -> (i32, i32) {
    %c0_i32 = arith.constant 0 : i32
    %c0_i32_0 = arith.constant 0 : i32
    return %arg0, %c0_i32 : i32, i32
  }
}

</mosaic_0001>

<bundles_post_ra>
// kernel: tpu_custom_call.1
= control target key start
LH: loop header
LB: loop body
LE: loop exit
PB: predicated region body
PF: predicated region fallthrough
CT: control target
= control target key end

     0   :  { %v867_v3 = vmov 0.0|0.0   ;;  %vm868_vm0 = vmmov 0   ;;  %v869_v12 = vmov 0.0   ;;  %vm31_vm1 = vcmask 523264   ;;  %s1040_s0 = inlined_call_operand.vmem [shape: f32[2,64], index: 0, kind: input, shape index: {}]   ;;  %s1041_s1 = inlined_call_operand.vmem [shape: f32[64,8], index: 1, kind: input, shape index: {}]   ;;  %s1042_s2 = inlined_call_operand.vmem [shape: f32[1,8], index: 2, kind: input, shape index: {}]   ;;  %s1043_s3 = inlined_call_operand.hbm [shape: f32[2,8], index: 3, kind: output, shape index: {}]  }
   0x1   :  { %v16_v0 = vld [vmem:[%s1041_s1] sm:$0xff]  ;;  %v17_v1 = vld [vmem:[%s1041_s1 + $0x8] sm:$0xff]  ;;  %v18_v2 = vld [vmem:[%s1041_s1 + $0x10] sm:$0xff]  ;;  %757 = vmatprep.subr.bf16.mxu1 %v867_v3  ;;  %793 = vmatprep.subr.bf16.mxu0 %v867_v3 }
   0x2   :  { %v36_v4 = vand.u32 4294901760, %v16_v0  ;;  %v39_v5 = vand.u32 4294901760, %v17_v1  ;;  %v19_v6 = vld [vmem:[%s1041_s1 + $0x18] sm:$0xff]  ;;  %v42_v7 = vand.u32 4294901760, %v18_v2  ;;  %v20_v8 = vld [vmem:[%s1041_s1 + $0x20] sm:$0xff]  ;;  %v21_v9 = vld [vmem:[%s1041_s1 + $0x28] sm:$0xff]  ;;  %659 = vmatprep.mubr.msk.f32.mxu1 %vm868_vm0, %v869_v12  ;;  %716 = vmatprep.mubr.msk.f32.mxu0 %vm868_vm0, %v869_v12 }
   0x3   :  { %v45_v10 = vand.u32 4294901760, %v19_v6  ;;  %v48_v11 = vand.u32 4294901760, %v20_v8  ;;  %v51_v16 = vand.u32 4294901760, %v21_v9  ;;  %v15_v17 = vld [vmem:[%s1040_s0] sm:$0x3] }
   0x4   :  { %v915_v13 = vpack.c.bf16 %v39_v5, %v36_v4  ;;  %v917_v14 = vsub.f32 %v16_v0, %v36_v4  ;;  %v919_v15 = vsub.f32 %v17_v1, %v39_v5 }
   0x5   :  { %8 = vsyncpa [#allocation3], 0  ;;  %v924_v18 = vsub.f32 %v18_v2, %v42_v7  ;;  %v926_v19 = vsub.f32 %v19_v6, %v45_v10  ;;  %v22_v20 = vld [vmem:[%s1041_s1 + $0x30] sm:$0xff]  ;;  %v23_v21 = vld [vmem:[%s1041_s1 + $0x38] sm:$0xff]  ;;  %v936_v22 = vpack.c.bf16 %v45_v10, %v42_v7  ;;  %v33_v23 = vsel %vm31_vm1, %v15_v17, 0  ;;  %s870_s30 = smov [#allocation2]  }
   0x6   :  { %759 = vmatpush3.bf16.msra.mxu1 %v915_v13  ;;  %795 = vmatpush3.bf16.msra.mxu0 %v915_v13  ;;  %v940_v24 = vand.u32 4294901760, %v33_v23  ;;  %v121_v25 = vand.u32 4294901760, %v917_v14  ;;  %v128_v26 = vand.u32 4294901760, %v919_v15  ;;  %v944_v27 = vpack.c.bf16 %v51_v16, %v48_v11  ;;  %v588_v10 = vld [vmem:[%s1042_s2] ss:$0 sm:$0xff]  ;;  %s580_s4 = sshll.u32 %s870_s30, 4  ;;  %s581_s4 = int_to_ptr.vmem [resolvable:$true] %s580_s4 }
   0x7   :  { %760 = vmatprep.subr.bf16.mxu1 %v867_v3  ;;  %796 = vmatprep.subr.bf16.mxu0 %v867_v3  ;;  %v54_v28 = vand.u32 4294901760, %v22_v20  ;;  %v57_v29 = vand.u32 4294901760, %v23_v21  ;;  %v946_v30 = vsub.f32 %v20_v8, %v48_v11  ;;  %v135_v32 = vand.u32 4294901760, %v924_v18  ;;  %s843_s5 = scalar_lea.vmem %s581_s4, 32  ;;  %p848_p1 = scmp.lt.s32.totalorder %s581_s4, %s581_s4 }
   0x8   :  { %v949_v31 = vsub.f32 %v33_v23, %v940_v24  ;;  %v142_v33 = vand.u32 4294901760, %v926_v19  ;;  %v955_v34 = vsub.f32 %v21_v9, %v51_v16  ;;  %v122_v35 = vsub.f32 %v917_v14, %v121_v25  ;;  %p844_p0 = scmp.ne.s32.totalorder %s581_s4, %s843_s5  ;;  %p849_p2 = scmp.lt.s32.totalorder %s843_s5, %s843_s5 }
   0x9   :  { %v129_v36 = vsub.f32 %v919_v15, %v128_v26  ;;  %v962_v38 = vpack.c.bf16 %v57_v29, %v54_v28  ;;  %v964_v39 = vsub.f32 %v22_v20, %v54_v28  ;;  %v136_v41 = vsub.f32 %v924_v18, %v135_v32 }
   0xa   :  { %762 = vmatpush3.bf16.msra.mxu1 %v936_v22  ;;  %798 = vmatpush3.bf16.msra.mxu0 %v936_v22  ;;  %v110_v37 = vand.u32 4294901760, %v949_v31  ;;  %v143_v42 = vsub.f32 %v926_v19, %v142_v33  ;;  %v149_v43 = vand.u32 4294901760, %v946_v30  ;;  %v972_v44 = vsub.f32 %v23_v21, %v57_v29  ;;  %p850_p3 = por %p849_p2, %p848_p1 }
   0xb   :  { %763 = vmatprep.subr.bf16.mxu1 %v867_v3  ;;  %799 = vmatprep.subr.bf16.mxu0 %v867_v3  ;;  %v123_v45 = vand.u32 4294901760, %v122_v35  ;;  %v130_v46 = vand.u32 4294901760, %v129_v36  ;;  %v156_v47 = vand.u32 4294901760, %v955_v34  ;;  %v806_v48 = vpack.c.bf16 %v128_v26, %v121_v25 }
   0xc   :  { %v111_v40 = vsub.f32 %v949_v31, %v110_v37  ;;  %v137_v50 = vand.u32 4294901760, %v136_v41  ;;  %v144_v51 = vand.u32 4294901760, %v143_v42  ;;  %v150_v52 = vsub.f32 %v946_v30, %v149_v43  ;;  %p851_p4 = pnand %p850_p3, %p844_p0 }
   0xd   :  { %v770_v53 = vpack.c.bf16 %v130_v46, %v123_v45  ;;  %v157_v54 = vsub.f32 %v955_v34, %v156_v47  ;;  %v163_v55 = vand.u32 4294901760, %v964_v39  ;;  %v170_v56 = vand.u32 4294901760, %v972_v44 }
   0xe   :  { %765 = vmatpush3.bf16.msra.mxu1 %v944_v27  ;;  %801 = vmatpush3.bf16.msra.mxu0 %v944_v27  ;;  %v112_v49 = vand.u32 4294901760, %v111_v40  ;;  %v773_v57 = vpack.c.bf16 %v144_v51, %v137_v50  ;;  %v809_v58 = vpack.c.bf16 %v142_v33, %v135_v32  ;;  %v151_v59 = vand.u32 4294901760, %v150_v52 }
   0xf   :  { %766 = vmatprep.subr.bf16.mxu1 %v867_v3  ;;  %802 = vmatprep.subr.bf16.mxu0 %v867_v3  ;;  %v158_v60 = vand.u32 4294901760, %v157_v54  ;;  %v164_v61 = vsub.f32 %v964_v39, %v163_v55  ;;  %v171_v62 = vsub.f32 %v972_v44, %v170_v56  ;;  %v812_v0 = vpack.c.bf16 %v156_v47, %v149_v43 }
  0x10   :  { %v815_v5 = vpack.c.bf16 %v170_v56, %v163_v55  ;;  %v782_v6 = vpack.c.bf16 %v919_v15, %v917_v14  ;;  %v785_v7 = vpack.c.bf16 %v926_v19, %v924_v18  ;;  %v788_v8 = vpack.c.bf16 %v955_v34, %v946_v30 }
  0x11   :  { %v776_v63 = vpack.c.bf16 %v158_v60, %v151_v59  ;;  %v165_v1 = vand.u32 4294901760, %v164_v61  ;;  %v172_v2 = vand.u32 4294901760, %v171_v62  ;;  %v791_v9 = vpack.c.bf16 %v972_v44, %v964_v39 }
  0x12   :  { %768 = vmatpush3.bf16.msra.mxu1 %v962_v38  ;;  %804 = vmatpush3.bf16.msra.mxu0 %v962_v38  ;;  %vm572_vm2 = vcmask 58368  }
  0x13   :  { %769 = vmatprep.subr.bf16.mxu1 %v867_v3  ;;  %805 = vmatprep.subr.bf16.mxu0 %v867_v3  ;;  %v779_v4 = vpack.c.bf16 %v172_v2, %v165_v1 }
  0x15   :  { %660 = vmatmul.mubr.f32.vlgmr.msra.gmra.mrb[0].mxu1 %v112_v49  ;;  %717 = vmatmul.mubr.f32.vlgmr.msra.gmra.mrb[0].mxu0 %v110_v37 }
  0x16   :  { %771 = vmatpush3.bf16.msra.mxu1 %v770_v53  ;;  %807 = vmatpush3.bf16.msra.mxu0 %v806_v48 }
  0x17   :  { %772 = vmatprep.subr.bf16.mxu1 %v867_v3  ;;  %808 = vmatprep.subr.bf16.mxu0 %v867_v3 }
  0x18   :  { %678 = vmatprep.mubr.msk.f32.mxu1 %vm868_vm0, %v869_v12  ;;  %735 = vmatprep.mubr.msk.f32.mxu0 %vm868_vm0, %v869_v12 }
  0x1a   :  { %774 = vmatpush3.bf16.msra.mxu1 %v773_v57  ;;  %810 = vmatpush3.bf16.msra.mxu0 %v809_v58 }
  0x1b   :  { %775 = vmatprep.subr.bf16.mxu1 %v867_v3  ;;  %811 = vmatprep.subr.bf16.mxu0 %v867_v3 }
  0x1e   :  { %777 = vmatpush3.bf16.msra.mxu1 %v776_v63  ;;  %813 = vmatpush3.bf16.msra.mxu0 %v812_v0 }
  0x1f   :  { %778 = vmatprep.subr.bf16.mxu1 %v867_v3  ;;  %814 = vmatprep.subr.bf16.mxu0 %v867_v3 }
  0x22   :  { %780 = vmatpush3.bf16.msra.mxu1 %v779_v4  ;;  %816 = vmatpush3.bf16.msra.mxu0 %v815_v5 }
  0x23   :  { %781 = vmatprep.subr.bf16.mxu1 %v867_v3  ;;  %817 = vmatprep.subr.bf16.mxu0 %v867_v3 }
  0x25   :  { %679 = vmatmul.mubr.f32.vlgmr.msra.gmra.mrb[0].mxu1 %v940_v24  ;;  %736 = vmatmul.mubr.f32.vlgmr.msra.gmra.mrb[0].mxu0 %v940_v24 }
  0x26   :  { %783 = vmatpush3.bf16.msra.mxu1 %v782_v6  ;;  %819 = vmatpush3.bf16.msra.mxu0 %v915_v13 }
  0x27   :  { %784 = vmatprep.subr.bf16.mxu1 %v867_v3  ;;  %820 = vmatprep.subr.bf16.mxu0 %v867_v3 }
  0x28   :  { %697 = vmatprep.mubr.msk.f32.mxu1 %vm868_vm0, %v869_v12  ;;  %754 = vmatprep.mubr.msk.f32.mxu0 %vm868_vm0, %v869_v12 }
  0x2a   :  { %786 = vmatpush3.bf16.msra.mxu1 %v785_v7  ;;  %822 = vmatpush3.bf16.msra.mxu0 %v936_v22 }
  0x2b   :  { %787 = vmatprep.subr.bf16.mxu1 %v867_v3  ;;  %823 = vmatprep.subr.bf16.mxu0 %v867_v3 }
  0x2e   :  { %789 = vmatpush3.bf16.msra.mxu1 %v788_v8  ;;  %825 = vmatpush3.bf16.msra.mxu0 %v944_v27 }
  0x2f   :  { %790 = vmatprep.subr.bf16.mxu1 %v867_v3  ;;  %826 = vmatprep.subr.bf16.mxu0 %v867_v3 }
  0x32   :  { %792 = vmatpush3.bf16.msra.mxu1 %v791_v9  ;;  %828 = vmatpush3.bf16.msra.mxu0 %v962_v38 }
  0x35   :  { %698 = vmatmul.mubr.f32.vlgmr.msra.gmra.mrb[0].mxu1 %v949_v31  ;;  %755 = vmatmul.mubr.f32.vlgmr.msra.gmra.mrb[0].mxu0 %v940_v24 }
 0x108   :  { %v313_v11 = vpop.f32.mrb[0].mxu1  ;;  %v568_v12 = vpop.f32.mrb[0].mxu0 }
 0x109   :  { %v829_v13 = vadd.f32 %v588_v10, %v313_v11  ;;  %v699_v14 = vpop.f32.mrb[1].mxu1  ;;  %v756_v15 = vpop.f32.mrb[1].mxu0 }
 0x10b   :  { %v830_v3 = vadd.f32 %v829_v13, %v568_v12 }
 0x10d   :  { %573 = vst.msk [vmem:[#allocation2] sm:$0x3] %vm572_vm2, %v830_v3 }
 0x10e   :  { %854 = shalt.err (!%p851_p4)
}
 0x10f   :  { %s855_s7 = scalar_lea.hbm %s1043_s3, 32 }
 0x110   :  { %p856_p5 = scmp.ne.s32.totalorder %s1043_s3, %s855_s7  ;;  %p859_p6 = scmp.lt.u32.totalorder %s855_s7, %s1043_s3 }
 0x112   :  { %p861_p7 = pnand %p859_p6, %p856_p5 }
 0x114   :  { %864 = shalt.err (!%p861_p7)
}
 0x115   :  { %583 = dma.vmem_to_hbm [thread:$0]  %s581_s4, 32, %s1043_s3, [#allocation3]  }
 0x116   :  { %865 = dma.done.wait [#allocation3], 32  }
 0x117   :  { %866 = vsyncadd [#allocation3], 4294967264 }
 0x118   :  { %587 = vsyncpa [#allocation3], 1 }

// kernel: tpu_custom_call.1
= control target key start
LH: loop header
LB: loop body
LE: loop exit
PB: predicated region body
PF: predicated region fallthrough
CT: control target
= control target key end

     0   :  { %v867_v3 = vmov 0.0|0.0   ;;  %vm868_vm0 = vmmov 0   ;;  %v869_v12 = vmov 0.0   ;;  %vm31_vm1 = vcmask 523264   ;;  %s1040_s0 = inlined_call_operand.vmem [shape: f32[2,64], index: 0, kind: input, shape index: {}]   ;;  %s1041_s1 = inlined_call_operand.vmem [shape: f32[64,8], index: 1, kind: input, shape index: {}]   ;;  %s1042_s2 = inlined_call_operand.vmem [shape: f32[1,8], index: 2, kind: input, shape index: {}]   ;;  %s1043_s3 = inlined_call_operand.hbm [shape: f32[2,8], index: 3, kind: output, shape index: {}]  }
   0x1   :  { %v16_v0 = vld [vmem:[%s1041_s1] sm:$0xff]  ;;  %v17_v1 = vld [vmem:[%s1041_s1 + $0x8] sm:$0xff]  ;;  %v18_v2 = vld [vmem:[%s1041_s1 + $0x10] sm:$0xff]  ;;  %757 = vmatprep.subr.bf16.mxu1 %v867_v3  ;;  %793 = vmatprep.subr.bf16.mxu0 %v867_v3 }
   0x2   :  { %v36_v4 = vand.u32 4294901760, %v16_v0  ;;  %v39_v5 = vand.u32 4294901760, %v17_v1  ;;  %v19_v6 = vld [vmem:[%s1041_s1 + $0x18] sm:$0xff]  ;;  %v42_v7 = vand.u32 4294901760, %v18_v2  ;;  %v20_v8 = vld [vmem:[%s1041_s1 + $0x20] sm:$0xff]  ;;  %v21_v9 = vld [vmem:[%s1041_s1 + $0x28] sm:$0xff]  ;;  %659 = vmatprep.mubr.msk.f32.mxu1 %vm868_vm0, %v869_v12  ;;  %716 = vmatprep.mubr.msk.f32.mxu0 %vm868_vm0, %v869_v12 }
   0x3   :  { %v45_v10 = vand.u32 4294901760, %v19_v6  ;;  %v48_v11 = vand.u32 4294901760, %v20_v8  ;;  %v51_v16 = vand.u32 4294901760, %v21_v9  ;;  %v15_v17 = vld [vmem:[%s1040_s0] sm:$0x3] }
   0x4   :  { %v915_v13 = vpack.c.bf16 %v39_v5, %v36_v4  ;;  %v917_v14 = vsub.f32 %v16_v0, %v36_v4  ;;  %v919_v15 = vsub.f32 %v17_v1, %v39_v5 }
   0x5   :  { %8 = vsyncpa [#allocation3], 0  ;;  %v924_v18 = vsub.f32 %v18_v2, %v42_v7  ;;  %v926_v19 = vsub.f32 %v19_v6, %v45_v10  ;;  %v22_v20 = vld [vmem:[%s1041_s1 + $0x30] sm:$0xff]  ;;  %v23_v21 = vld [vmem:[%s1041_s1 + $0x38] sm:$0xff]  ;;  %v936_v22 = vpack.c.bf16 %v45_v10, %v42_v7  ;;  %v33_v23 = vsel %vm31_vm1, %v15_v17, 0  ;;  %s870_s30 = smov [#allocation2]  }
   0x6   :  { %759 = vmatpush3.bf16.msra.mxu1 %v915_v13  ;;  %795 = vmatpush3.bf16.msra.mxu0 %v915_v13  ;;  %v940_v24 = vand.u32 4294901760, %v33_v23  ;;  %v121_v25 = vand.u32 4294901760, %v917_v14  ;;  %v128_v26 = vand.u32 4294901760, %v919_v15  ;;  %v944_v27 = vpack.c.bf16 %v51_v16, %v48_v11  ;;  %v588_v10 = vld [vmem:[%s1042_s2] ss:$0 sm:$0xff]  ;;  %s580_s4 = sshll.u32 %s870_s30, 4  ;;  %s581_s4 = int_to_ptr.vmem [resolvable:$true] %s580_s4 }
   0x7   :  { %760 = vmatprep.subr.bf16.mxu1 %v867_v3  ;;  %796 = vmatprep.subr.bf16.mxu0 %v867_v3  ;;  %v54_v28 = vand.u32 4294901760, %v22_v20  ;;  %v57_v29 = vand.u32 4294901760, %v23_v21  ;;  %v946_v30 = vsub.f32 %v20_v8, %v48_v11  ;;  %v135_v32 = vand.u32 4294901760, %v924_v18  ;;  %s843_s5 = scalar_lea.vmem %s581_s4, 32  ;;  %p848_p1 = scmp.lt.s32.totalorder %s581_s4, %s581_s4 }
   0x8   :  { %v949_v31 = vsub.f32 %v33_v23, %v940_v24  ;;  %v142_v33 = vand.u32 4294901760, %v926_v19  ;;  %v955_v34 = vsub.f32 %v21_v9, %v51_v16  ;;  %v122_v35 = vsub.f32 %v917_v14, %v121_v25  ;;  %p844_p0 = scmp.ne.s32.totalorder %s581_s4, %s843_s5  ;;  %p849_p2 = scmp.lt.s32.totalorder %s843_s5, %s843_s5 }
   0x9   :  { %v129_v36 = vsub.f32 %v919_v15, %v128_v26  ;;  %v962_v38 = vpack.c.bf16 %v57_v29, %v54_v28  ;;  %v964_v39 = vsub.f32 %v22_v20, %v54_v28  ;;  %v136_v41 = vsub.f32 %v924_v18, %v135_v32 }
   0xa   :  { %762 = vmatpush3.bf16.msra.mxu1 %v936_v22  ;;  %798 = vmatpush3.bf16.msra.mxu0 %v936_v22  ;;  %v110_v37 = vand.u32 4294901760, %v949_v31  ;;  %v143_v42 = vsub.f32 %v926_v19, %v142_v33  ;;  %v149_v43 = vand.u32 4294901760, %v946_v30  ;;  %v972_v44 = vsub.f32 %v23_v21, %v57_v29  ;;  %p850_p3 = por %p849_p2, %p848_p1 }
   0xb   :  { %763 = vmatprep.subr.bf16.mxu1 %v867_v3  ;;  %799 = vmatprep.subr.bf16.mxu0 %v867_v3  ;;  %v123_v45 = vand.u32 4294901760, %v122_v35  ;;  %v130_v46 = vand.u32 4294901760, %v129_v36  ;;  %v156_v47 = vand.u32 4294901760, %v955_v34  ;;  %v806_v48 = vpack.c.bf16 %v128_v26, %v121_v25 }
   0xc   :  { %v111_v40 = vsub.f32 %v949_v31, %v110_v37  ;;  %v137_v50 = vand.u32 4294901760, %v136_v41  ;;  %v144_v51 = vand.u32 4294901760, %v143_v42  ;;  %v150_v52 = vsub.f32 %v946_v30, %v149_v43  ;;  %p851_p4 = pnand %p850_p3, %p844_p0 }
   0xd   :  { %v770_v53 = vpack.c.bf16 %v130_v46, %v123_v45  ;;  %v157_v54 = vsub.f32 %v955_v34, %v156_v47  ;;  %v163_v55 = vand.u32 4294901760, %v964_v39  ;;  %v170_v56 = vand.u32 4294901760, %v972_v44 }
   0xe   :  { %765 = vmatpush3.bf16.msra.mxu1 %v944_v27  ;;  %801 = vmatpush3.bf16.msra.mxu0 %v944_v27  ;;  %v112_v49 = vand.u32 4294901760, %v111_v40  ;;  %v773_v57 = vpack.c.bf16 %v144_v51, %v137_v50  ;;  %v809_v58 = vpack.c.bf16 %v142_v33, %v135_v32  ;;  %v151_v59 = vand.u32 4294901760, %v150_v52 }
   0xf   :  { %766 = vmatprep.subr.bf16.mxu1 %v867_v3  ;;  %802 = vmatprep.subr.bf16.mxu0 %v867_v3  ;;  %v158_v60 = vand.u32 4294901760, %v157_v54  ;;  %v164_v61 = vsub.f32 %v964_v39, %v163_v55  ;;  %v171_v62 = vsub.f32 %v972_v44, %v170_v56  ;;  %v812_v0 = vpack.c.bf16 %v156_v47, %v149_v43 }
  0x10   :  { %v815_v5 = vpack.c.bf16 %v170_v56, %v163_v55  ;;  %v782_v6 = vpack.c.bf16 %v919_v15, %v917_v14  ;;  %v785_v7 = vpack.c.bf16 %v926_v19, %v924_v18  ;;  %v788_v8 = vpack.c.bf16 %v955_v34, %v946_v30 }
  0x11   :  { %v776_v63 = vpack.c.bf16 %v158_v60, %v151_v59  ;;  %v165_v1 = vand.u32 4294901760, %v164_v61  ;;  %v172_v2 = vand.u32 4294901760, %v171_v62  ;;  %v791_v9 = vpack.c.bf16 %v972_v44, %v964_v39 }
  0x12   :  { %768 = vmatpush3.bf16.msra.mxu1 %v962_v38  ;;  %804 = vmatpush3.bf16.msra.mxu0 %v962_v38  ;;  %vm572_vm2 = vcmask 58368  }
  0x13   :  { %769 = vmatprep.subr.bf16.mxu1 %v867_v3  ;;  %805 = vmatprep.subr.bf16.mxu0 %v867_v3  ;;  %v779_v4 = vpack.c.bf16 %v172_v2, %v165_v1 }
  0x15   :  { %660 = vmatmul.mubr.f32.vlgmr.msra.gmra.mrb[0].mxu1 %v112_v49  ;;  %717 = vmatmul.mubr.f32.vlgmr.msra.gmra.mrb[0].mxu0 %v110_v37 }
  0x16   :  { %771 = vmatpush3.bf16.msra.mxu1 %v770_v53  ;;  %807 = vmatpush3.bf16.msra.mxu0 %v806_v48 }
  0x17   :  { %772 = vmatprep.subr.bf16.mxu1 %v867_v3  ;;  %808 = vmatprep.subr.bf16.mxu0 %v867_v3 }
  0x18   :  { %678 = vmatprep.mubr.msk.f32.mxu1 %vm868_vm0, %v869_v12  ;;  %735 = vmatprep.mubr.msk.f32.mxu0 %vm868_vm0, %v869_v12 }
  0x1a   :  { %774 = vmatpush3.bf16.msra.mxu1 %v773_v57  ;;  %810 = vmatpush3.bf16.msra.mxu0 %v809_v58 }
  0x1b   :  { %775 = vmatprep.subr.bf16.mxu1 %v867_v3  ;;  %811 = vmatprep.subr.bf16.mxu0 %v867_v3 }
  0x1e   :  { %777 = vmatpush3.bf16.msra.mxu1 %v776_v63  ;;  %813 = vmatpush3.bf16.msra.mxu0 %v812_v0 }
  0x1f   :  { %778 = vmatprep.subr.bf16.mxu1 %v867_v3  ;;  %814 = vmatprep.subr.bf16.mxu0 %v867_v3 }
  0x22   :  { %780 = vmatpush3.bf16.msra.mxu1 %v779_v4  ;;  %816 = vmatpush3.bf16.msra.mxu0 %v815_v5 }
  0x23   :  { %781 = vmatprep.subr.bf16.mxu1 %v867_v3  ;;  %817 = vmatprep.subr.bf16.mxu0 %v867_v3 }
  0x25   :  { %679 = vmatmul.mubr.f32.vlgmr.msra.gmra.mrb[0].mxu1 %v940_v24  ;;  %736 = vmatmul.mubr.f32.vlgmr.msra.gmra.mrb[0].mxu0 %v940_v24 }
  0x26   :  { %783 = vmatpush3.bf16.msra.mxu1 %v782_v6  ;;  %819 = vmatpush3.bf16.msra.mxu0 %v915_v13 }
  0x27   :  { %784 = vmatprep.subr.bf16.mxu1 %v867_v3  ;;  %820 = vmatprep.subr.bf16.mxu0 %v867_v3 }
  0x28   :  { %697 = vmatprep.mubr.msk.f32.mxu1 %vm868_vm0, %v869_v12  ;;  %754 = vmatprep.mubr.msk.f32.mxu0 %vm868_vm0, %v869_v12 }
  0x2a   :  { %786 = vmatpush3.bf16.msra.mxu1 %v785_v7  ;;  %822 = vmatpush3.bf16.msra.mxu0 %v936_v22 }
  0x2b   :  { %787 = vmatprep.subr.bf16.mxu1 %v867_v3  ;;  %823 = vmatprep.subr.bf16.mxu0 %v867_v3 }
  0x2e   :  { %789 = vmatpush3.bf16.msra.mxu1 %v788_v8  ;;  %825 = vmatpush3.bf16.msra.mxu0 %v944_v27 }
  0x2f   :  { %790 = vmatprep.subr.bf16.mxu1 %v867_v3  ;;  %826 = vmatprep.subr.bf16.mxu0 %v867_v3 }
  0x32   :  { %792 = vmatpush3.bf16.msra.mxu1 %v791_v9  ;;  %828 = vmatpush3.bf16.msra.mxu0 %v962_v38 }
  0x35   :  { %698 = vmatmul.mubr.f32.vlgmr.msra.gmra.mrb[0].mxu1 %v949_v31  ;;  %755 = vmatmul.mubr.f32.vlgmr.msra.gmra.mrb[0].mxu0 %v940_v24 }
 0x108   :  { %v313_v11 = vpop.f32.mrb[0].mxu1  ;;  %v568_v12 = vpop.f32.mrb[0].mxu0 }
 0x109   :  { %v829_v13 = vadd.f32 %v588_v10, %v313_v11  ;;  %v699_v14 = vpop.f32.mrb[1].mxu1  ;;  %v756_v15 = vpop.f32.mrb[1].mxu0 }
 0x10b   :  { %v830_v3 = vadd.f32 %v829_v13, %v568_v12 }
 0x10d   :  { %573 = vst.msk [vmem:[#allocation2] sm:$0x3] %vm572_vm2, %v830_v3 }
 0x10e   :  { %854 = shalt.err (!%p851_p4)
}
 0x10f   :  { %s855_s7 = scalar_lea.hbm %s1043_s3, 32 }
 0x110   :  { %p856_p5 = scmp.ne.s32.totalorder %s1043_s3, %s855_s7  ;;  %p859_p6 = scmp.lt.u32.totalorder %s855_s7, %s1043_s3 }
 0x112   :  { %p861_p7 = pnand %p859_p6, %p856_p5 }
 0x114   :  { %864 = shalt.err (!%p861_p7)
}
 0x115   :  { %583 = dma.vmem_to_hbm [thread:$0]  %s581_s4, 32, %s1043_s3, [#allocation3]  }
 0x116   :  { %865 = dma.done.wait [#allocation3], 32  }
 0x117   :  { %866 = vsyncadd [#allocation3], 4294967264 }
 0x118   :  { %587 = vsyncpa [#allocation3], 1 }

</bundles_post_ra>
